<compile_context>
chip_gen: v5e
topology: v5e:2x2
jax: 0.10.0
libtpu: 0.0.40
codegen_flags: <defaults>
</compile_context>

<pallas_src>
import functools

import jax
import jax.numpy as jnp
from jax.experimental import pallas as pl
from jax.experimental.pallas import tpu as pltpu


def _pred_mlp_kernel(x_ref, w1_ref, gb_ref, w2_ref, b2_ref, o_ref,
                     *scratch, eps):
    # scratch is () when the output dtype is f32 (accumulate directly into
    # o_ref), or (acc_ref,) holding an f32 accumulator for narrower outputs.
    acc_ref = scratch[0] if scratch else o_ref
    k = pl.program_id(1)  # hidden (reduction) axis, innermost

    @pl.when(k == 0)
    def _():
        # Fold b2 into the accumulator init (saves an epilogue RMW pass).
        acc_ref[...] = jnp.broadcast_to(b2_ref[...], acc_ref.shape)

    # ----- layer1: Linear(D -> H_tile), bf16 operands, f32 accumulation -----
    # b1 omitted (exactly cancelled by batch-statistic BatchNorm).
    h = jnp.dot(x_ref[...], w1_ref[...], preferred_element_type=jnp.float32)

    # ----- BatchNorm1d (batch stats, all f32) + ReLU folded into one FMA ----
    inv_n = 1.0 / h.shape[0]
    mean = jnp.sum(h, axis=0, keepdims=True) * inv_n
    mean_sq = jnp.sum(h * h, axis=0, keepdims=True) * inv_n
    var = jnp.maximum(mean_sq - mean * mean, 0.0)    # clamp f32 cancellation
    scale = gb_ref[0:1, :] * jax.lax.rsqrt(var + eps)   # gamma / sqrt(var+eps)
    shift = gb_ref[1:2, :] - mean * scale                # beta - mean*scale
    h = jnp.maximum(h * scale + shift, 0.0)

    # ----- layer2 partial: accumulate h_tile @ W2[tile, :] (bf16 operands) --
    acc_ref[...] += jnp.dot(h.astype(w2_ref.dtype), w2_ref[...],
                            preferred_element_type=jnp.float32)

    @pl.when(k == pl.num_programs(1) - 1)
    def _():
        if scratch:
            o_ref[...] = acc_ref[...].astype(o_ref.dtype)


def prediction_mlp_forward(x, w1, b1, gamma, beta, w2, b2, *,
                           hidden_tile=512, out_tile=None, eps=1e-5,
                           compute_dtype=jnp.bfloat16):
    """x: (N, D); w1: (D, H); b1/gamma/beta: (H,); w2: (H, O); b2: (O,)."""
    del b1  # exactly cancelled by batch-statistic BatchNorm (shift invariance)

    N, D = x.shape
    H = w1.shape[1]
    O = w2.shape[1]
    out_dtype = x.dtype
    hidden_tile = min(hidden_tile, H)
    assert H % hidden_tile == 0, (H, hidden_tile)
    n_h = H // hidden_tile

    # Pad the layer2 output/lane dim to a multiple of 128 -> lane-dense stores.
    O_pad = ((O + 127) // 128) * 128
    if O_pad != O:
        w2 = jnp.pad(w2, ((0, 0), (0, O_pad - O)))
        b2 = jnp.pad(b2, (0, O_pad - O))
    if out_tile is None:
        out_tile = O_pad                      # single O tile
    assert O_pad % out_tile == 0 and out_tile % 128 == 0
    n_o = O_pad // out_tile

    # Pre-cast the byte-heavy operands (x, W1, W2) to the compute dtype in the
    # wrapper: halves their HBM->VMEM DMA traffic and avoids per-step casts.
    # gamma/beta/b2 stay f32 (they feed f32 BN math / the f32 accumulator).
    x_c = x.astype(compute_dtype)
    w1_c = w1.astype(compute_dtype)
    w2_c = w2.astype(compute_dtype)
    gb = jnp.stack([gamma, beta], axis=0).astype(jnp.float32)   # (2, H)
    b2_2d = b2.reshape(1, O_pad).astype(jnp.float32)

    direct_acc = (out_dtype == jnp.float32)
    scratch_shapes = () if direct_acc else (
        pltpu.VMEM((N, out_tile), jnp.float32),)

    c_bytes = jnp.dtype(compute_dtype).itemsize
    o_bytes = jnp.dtype(out_dtype).itemsize
    n_out_bufs = 1 if n_o == 1 else 2

    # Guard the un-tiled whole-batch x block against v7x's 64 MiB VMEM.
    x_block_bytes = N * D * c_bytes
    assert x_block_bytes <= (40 << 20), (
        f"whole-batch x block ({x_block_bytes} B) too large for v7x VMEM; "
        "tile the batch dimension or shrink hidden_tile")

    # VMEM budget: single-buffered x/b2, double-buffered W1/W2/params,
    # output block counted once when it is itself the accumulator.
    est_bytes = (
        N * D * c_bytes                           # x (Buffered(1))
        + 2 * D * hidden_tile * c_bytes           # W1 tiles (double-buffered)
        + 2 * 2 * hidden_tile * 4                 # gamma/beta tiles (f32)
        + 2 * hidden_tile * out_tile * c_bytes    # W2 tiles (double-buffered)
        + out_tile * 4                            # b2 (Buffered(1), f32)
        + n_out_bufs * N * out_tile * o_bytes     # output block(s)
        + (0 if direct_acc else N * out_tile * 4)  # f32 scratch accumulator
    )
    # Cap at 56 MiB: leaves ~8 MiB headroom under v7x's 64 MiB physical VMEM.
    vmem_limit = int(min(max(1.25 * est_bytes + (4 << 20), 32 << 20), 56 << 20))

    kernel = functools.partial(_pred_mlp_kernel, eps=eps)

    out = pl.pallas_call(
        kernel,
        out_shape=jax.ShapeDtypeStruct((N, O_pad), out_dtype),
        grid_spec=pltpu.PrefetchScalarGridSpec(
            num_scalar_prefetch=0,
            grid=(n_o, n_h),
            in_specs=[
                pl.BlockSpec((N, D), lambda j, k: (0, 0),
                             pipeline_mode=pl.Buffered(1)),            # x
                pl.BlockSpec((D, hidden_tile), lambda j, k: (0, k)),   # W1 tile
                pl.BlockSpec((2, hidden_tile), lambda j, k: (0, k)),   # gamma/beta
                pl.BlockSpec((hidden_tile, out_tile),
                             lambda j, k: (k, j)),                     # W2 tile
                pl.BlockSpec((1, out_tile), lambda j, k: (0, j),
                             pipeline_mode=pl.Buffered(1)),            # b2
            ],
            out_specs=pl.BlockSpec((N, out_tile), lambda j, k: (0, j),
                                   pipeline_mode=pl.Buffered(n_out_bufs)),
            scratch_shapes=scratch_shapes,
        ),
        compiler_params=pltpu.CompilerParams(
            dimension_semantics=("parallel", "arbitrary"),
            vmem_limit_bytes=vmem_limit),
    )(x_c, w1_c, gb, w2_c, b2_2d)

    return out[:, :O] if O_pad != O else out


def prediction_mlp_reference(x, w1, b1, gamma, beta, w2, b2, eps=1e-5):
    h = x @ w1 + b1
    mean = jnp.mean(h, axis=0, keepdims=True)
    var = jnp.mean((h - mean) ** 2, axis=0, keepdims=True)
    h = (h - mean) / jnp.sqrt(var + eps)
    h = h * gamma + beta
    h = jnp.maximum(h, 0.0)
    return h @ w2 + b2


if __name__ == "__main__":
    # Small shapes consistent with the module (scaled down from 256/4096/256).
    # H=512 exercises the single-step (n_h=1) default and the multi-step
    # accumulation path (hidden_tile=256); O=64 exercises lane-dim padding.
    N, D, H, O = 16, 64, 512, 64

    key = jax.random.PRNGKey(0)
    kx, kw1, kb1, kg, kbt, kw2, kb2 = jax.random.split(key, 7)

    x = jax.random.normal(kx, (N, D), dtype=jnp.float32)

    # Deterministic parameter init (torch Linear-ish uniform scale).
    w1 = jax.random.uniform(kw1, (D, H), jnp.float32, -1.0, 1.0) / jnp.sqrt(D)
    b1 = jax.random.uniform(kb1, (H,), jnp.float32, -1.0, 1.0) / jnp.sqrt(D)
    gamma = jax.random.uniform(kg, (H,), jnp.float32, 0.5, 1.5)
    beta = 0.1 * jax.random.normal(kbt, (H,), jnp.float32)
    w2 = jax.random.uniform(kw2, (H, O), jnp.float32, -1.0, 1.0) / jnp.sqrt(H)
    b2 = jax.random.uniform(kb2, (O,), jnp.float32, -1.0, 1.0) / jnp.sqrt(H)

    ref = prediction_mlp_reference(x, w1, b1, gamma, beta, w2, b2)

    # Default tiling: hidden_tile=512 -> single grid step along H.
    out = prediction_mlp_forward(x, w1, b1, gamma, beta, w2, b2)
    out = jax.block_until_ready(out)
    assert out.shape == (N, O)
    err = float(jnp.max(jnp.abs(out - ref)))
    # bf16 MXU operands (f32 accumulation) -> loosened tolerance vs f32 ref.
    assert jnp.allclose(out, ref, atol=5e-2, rtol=5e-2), f"max abs err {err}"

    # hidden_tile=256 exercises the multi-step reduction / resident-acc path.
    out2 = jax.block_until_ready(
        prediction_mlp_forward(x, w1, b1, gamma, beta, w2, b2,
                               hidden_tile=256))
    err2 = float(jnp.max(jnp.abs(out2 - ref)))
    assert jnp.allclose(out2, ref, atol=5e-2, rtol=5e-2), f"max abs err {err2}"

    print("KERNEL_OK")
</pallas_src>

<mosaic_0001>
module attributes {stable_mosaic.version = 11 : i64} {
  func.func @_pred_mlp_kernel(%arg0: i32, %arg1: i32, %arg2: memref<16x64xbf16, #tpu.memory_space<vmem>>, %arg3: memref<64x512xbf16, #tpu.memory_space<vmem>>, %arg4: memref<2x512xf32, #tpu.memory_space<vmem>>, %arg5: memref<512x128xbf16, #tpu.memory_space<vmem>>, %arg6: memref<1x128xf32, #tpu.memory_space<vmem>>, %arg7: memref<16x128xf32, #tpu.memory_space<vmem>>) attributes {dimension_semantics = [#tpu.dimension_semantics<parallel>, #tpu.dimension_semantics<arbitrary>], iteration_bounds = array<i64: 1, 1>, scalar_prefetch = 0 : i64, scratch_operands = 0 : i64, tpu.core_type = #tpu.core_type<tc>, window_params = [{pipeline_mode = #tpu.pipeline_mode<synchronous>, transform_indices = @transform_0, window_bounds = array<i64: 16, 64>}, {transform_indices = @transform_1, window_bounds = array<i64: 64, 512>}, {transform_indices = @transform_2, window_bounds = array<i64: 2, 512>}, {transform_indices = @transform_3, window_bounds = array<i64: 512, 128>}, {pipeline_mode = #tpu.pipeline_mode<synchronous>, transform_indices = @transform_4, window_bounds = array<i64: 1, 128>}, {pipeline_mode = #tpu.pipeline_mode<synchronous>, transform_indices = @transform_5, window_bounds = array<i64: 16, 128>}]} {
    %c0_i32 = arith.constant 0 : i32
    %0 = arith.cmpi eq, %arg1, %c0_i32 : i32
    %1 = arith.extui %0 : i1 to i32
    %c0_i32_0 = arith.constant 0 : i32
    %2 = arith.cmpi ne, %1, %c0_i32_0 : i32
    scf.if %2 {
      %c0_21 = arith.constant 0 : index
      %c0_22 = arith.constant 0 : index
      %39 = vector.load %arg6[%c0_21, %c0_22] : memref<1x128xf32, #tpu.memory_space<vmem>>, vector<1x128xf32>
      %40 = vector.shape_cast %39 : vector<1x128xf32> to vector<1x128xf32>
      %41 = vector.broadcast %40 : vector<1x128xf32> to vector<16x128xf32>
      %c0_23 = arith.constant 0 : index
      %c0_24 = arith.constant 0 : index
      %42 = vector.load %arg7[%c0_23, %c0_24] : memref<16x128xf32, #tpu.memory_space<vmem>>, vector<16x128xf32>
      tpu.vector_store %arg7[%c0_23, %c0_24], %41 {strides = array<i32>} : memref<16x128xf32, #tpu.memory_space<vmem>>, vector<16x128xf32>,
    } else {
    }
    %c0 = arith.constant 0 : index
    %c0_1 = arith.constant 0 : index
    %3 = vector.load %arg2[%c0, %c0_1] : memref<16x64xbf16, #tpu.memory_space<vmem>>, vector<16x64xbf16>
    %c0_2 = arith.constant 0 : index
    %c0_3 = arith.constant 0 : index
    %4 = vector.load %arg3[%c0_2, %c0_3] : memref<64x512xbf16, #tpu.memory_space<vmem>>, vector<64x512xbf16>
    %cst = arith.constant dense<0.000000e+00> : vector<16x512xf32>
    %5 = tpu.matmul %3, %4, %cst {dimension_numbers = #tpu.dot_dimension_numbers<[1], [0], [0], [1], [0, 0, 1, 1], [], []>} : vector<16x64xbf16>, vector<64x512xbf16>, vector<16x512xf32> -> vector<16x512xf32>
    %cst_4 = arith.constant dense<0.000000e+00> : vector<512xf32>
    %6 = vector.multi_reduction <add>, %5, %cst_4 [0] : vector<16x512xf32> to vector<512xf32>
    %7 = vector.shape_cast %6 : vector<512xf32> to vector<1x512xf32>
    %cst_5 = arith.constant 6.250000e-02 : f32
    %8 = vector.broadcast %cst_5 : f32 to vector<1x512xf32>
    %9 = arith.mulf %7, %8 : vector<1x512xf32>
    %10 = arith.mulf %5, %5 : vector<16x512xf32>
    %cst_6 = arith.constant dense<0.000000e+00> : vector<512xf32>
    %11 = vector.multi_reduction <add>, %10, %cst_6 [0] : vector<16x512xf32> to vector<512xf32>
    %12 = vector.shape_cast %11 : vector<512xf32> to vector<1x512xf32>
    %cst_7 = arith.constant 6.250000e-02 : f32
    %13 = vector.broadcast %cst_7 : f32 to vector<1x512xf32>
    %14 = arith.mulf %12, %13 : vector<1x512xf32>
    %15 = arith.mulf %9, %9 : vector<1x512xf32>
    %16 = arith.subf %14, %15 : vector<1x512xf32>
    %cst_8 = arith.constant 0.000000e+00 : f32
    %17 = vector.broadcast %cst_8 : f32 to vector<1x512xf32>
    %18 = arith.maximumf %16, %17 : vector<1x512xf32>
    %c0_9 = arith.constant 0 : index
    %c0_10 = arith.constant 0 : index
    %19 = vector.load %arg4[%c0_9, %c0_10] : memref<2x512xf32, #tpu.memory_space<vmem>>, vector<1x512xf32>
    %cst_11 = arith.constant 9.99999974E-6 : f32
    %20 = vector.broadcast %cst_11 : f32 to vector<1x512xf32>
    %21 = arith.addf %18, %20 : vector<1x512xf32>
    %22 = math.rsqrt %21 : vector<1x512xf32>
    %23 = arith.mulf %19, %22 : vector<1x512xf32>
    %c1 = arith.constant 1 : index
    %c0_12 = arith.constant 0 : index
    %24 = vector.load %arg4[%c1, %c0_12] : memref<2x512xf32, #tpu.memory_space<vmem>>, vector<1x512xf32>
    %25 = arith.mulf %9, %23 : vector<1x512xf32>
    %26 = arith.subf %24, %25 : vector<1x512xf32>
    %27 = vector.broadcast %23 : vector<1x512xf32> to vector<16x512xf32>
    %28 = arith.mulf %5, %27 : vector<16x512xf32>
    %29 = vector.broadcast %26 : vector<1x512xf32> to vector<16x512xf32>
    %30 = arith.addf %28, %29 : vector<16x512xf32>
    %cst_13 = arith.constant 0.000000e+00 : f32
    %31 = vector.broadcast %cst_13 : f32 to vector<16x512xf32>
    %32 = arith.maximumf %30, %31 : vector<16x512xf32>
    %c0_14 = arith.constant 0 : index
    %c0_15 = arith.constant 0 : index
    %33 = vector.load %arg7[%c0_14, %c0_15] : memref<16x128xf32, #tpu.memory_space<vmem>>, vector<16x128xf32>
    %34 = arith.truncf %32 : vector<16x512xf32> to vector<16x512xbf16>
    %c0_16 = arith.constant 0 : index
    %c0_17 = arith.constant 0 : index
    %35 = vector.load %arg5[%c0_16, %c0_17] : memref<512x128xbf16, #tpu.memory_space<vmem>>, vector<512x128xbf16>
    %cst_18 = arith.constant dense<0.000000e+00> : vector<16x128xf32>
    %36 = tpu.matmul %34, %35, %cst_18 {dimension_numbers = #tpu.dot_dimension_numbers<[1], [0], [0], [1], [0, 0, 1, 1], [], []>} : vector<16x512xbf16>, vector<512x128xbf16>, vector<16x128xf32> -> vector<16x128xf32>
    %37 = arith.addf %33, %36 : vector<16x128xf32>
    %c0_19 = arith.constant 0 : index
    %c0_20 = arith.constant 0 : index
    %38 = vector.load %arg7[%c0_19, %c0_20] : memref<16x128xf32, #tpu.memory_space<vmem>>, vector<16x128xf32>
    tpu.vector_store %arg7[%c0_19, %c0_20], %37 {strides = array<i32>} : memref<16x128xf32, #tpu.memory_space<vmem>>, vector<16x128xf32>,
    return
  }
  func.func @transform_0(%arg0: i32, %arg1: i32) -> (i32, i32) {
    %c0_i32 = arith.constant 0 : i32
    %c0_i32_0 = arith.constant 0 : i32
    %c0_i32_1 = arith.constant 0 : i32
    return %c0_i32, %c0_i32_0 : i32, i32
  }
  func.func @transform_1(%arg0: i32, %arg1: i32) -> (i32, i32) {
    %c0_i32 = arith.constant 0 : i32
    %c0_i32_0 = arith.constant 0 : i32
    return %c0_i32, %arg1 : i32, i32
  }
  func.func @transform_2(%arg0: i32, %arg1: i32) -> (i32, i32) {
    %c0_i32 = arith.constant 0 : i32
    %c0_i32_0 = arith.constant 0 : i32
    return %c0_i32, %arg1 : i32, i32
  }
  func.func @transform_3(%arg0: i32, %arg1: i32) -> (i32, i32) {
    %c0_i32 = arith.constant 0 : i32
    return %arg1, %arg0 : i32, i32
  }
  func.func @transform_4(%arg0: i32, %arg1: i32) -> (i32, i32) {
    %c0_i32 = arith.constant 0 : i32
    %c0_i32_0 = arith.constant 0 : i32
    return %c0_i32, %arg0 : i32, i32
  }
  func.func @transform_5(%arg0: i32, %arg1: i32) -> (i32, i32) {
    %c0_i32 = arith.constant 0 : i32
    %c0_i32_0 = arith.constant 0 : i32
    return %c0_i32, %arg0 : i32, i32
  }
}

</mosaic_0001>

<bundles_post_ra>
// kernel: tpu_custom_call.1
= control target key start
LH: loop header
LB: loop body
LE: loop exit
PB: predicated region body
PF: predicated region fallthrough
CT: control target
= control target key end

     0   :  { %10 = vsyncpa [#allocation3], 0  ;;  %s1360_s0 = inlined_call_operand.hbm [shape: bf16[16,64], index: 0, kind: input, shape index: {}]   ;;  %s1361_s1 = inlined_call_operand.hbm [shape: bf16[64,512], index: 1, kind: input, shape index: {}]   ;;  %s1362_s2 = inlined_call_operand.hbm [shape: f32[2,512], index: 2, kind: input, shape index: {}]   ;;  %s1363_s3 = inlined_call_operand.hbm [shape: bf16[512,128], index: 3, kind: input, shape index: {}]   ;;  %s1364_s4 = inlined_call_operand.vmem [shape: f32[1,128], index: 4, kind: input, shape index: {}]   ;;  %s1365_s5 = inlined_call_operand.hbm [shape: f32[16,128], index: 5, kind: output, shape index: {}]  }
   0x1   :  { %11 = vsyncpa [#allocation6], 0 }
   0x2   :  { %12 = vsyncpa [#allocation9], 0  ;;  %s31_s20 = sshll.u32 %s1361_s1, 4  ;;  %s32_s20 = int_to_ptr.hbm [resolvable:$true] %s31_s20 }
   0x3   :  { %13 = vsyncpa [#allocation4], 0  ;;  %s1200_s21 = smov [#allocation5]   ;;  %s18_s25 = sshll.u32 %s1360_s0, 4  ;;  %s19_s25 = int_to_ptr.hbm [resolvable:$true] %s18_s25 }
   0x4   :  { %s33_s22 = sshll.u32 %s1200_s21, 4  ;;  %s1201_s26 = smov 256   ;;  %s34_s22 = int_to_ptr.vmem [resolvable:$true] %s33_s22 }
   0x5   :  { %s1202_s27 = smov 16   ;;  %s1203_s28 = smov [#allocation2]  }
   0x6   :  { %39 = dma.hbm_to_vmem [thread:$0]  %s32_s20, 2048, %s34_s22, [#allocation6], %s1201_s26, %s1201_s26, %s1202_s27  }
   0x7   :  { %s20_s29 = sshll.u32 %s1203_s28, 4  ;;  %s1204_s30 = smov 64   ;;  %s21_s29 = int_to_ptr.vmem [resolvable:$true] %s20_s29 }
   0x8   :  { %s1205_s6 = smov 4   ;;  %s45_s8 = sshll.u32 %s1362_s2, 4  ;;  %s46_s8 = int_to_ptr.hbm [resolvable:$true] %s45_s8 }
   0x9   :  { %26 = dma.hbm_to_vmem [thread:$0]  %s19_s25, 128, %s21_s29, [#allocation3], %s1204_s30, %s1204_s30, %s1205_s6  }
   0xa   :  { %s1206_s9 = smov [#allocation7]   ;;  %s55_s12 = sshll.u32 %s1363_s3, 4  ;;  %s56_s12 = int_to_ptr.hbm [resolvable:$true] %s55_s12 }
   0xb   :  { %s47_s10 = sshll.u32 %s1206_s9, 4  ;;  %s1207_s13 = smov [#allocation8]   ;;  %s48_s10 = int_to_ptr.vmem [resolvable:$true] %s47_s10 }
   0xc   :  { %50 = dma.hbm_to_vmem [thread:$0]  %s46_s8, 128, %s48_s10, [#allocation6]  }
   0xd   :  { %s57_s14 = sshll.u32 %s1207_s13, 4  ;;  %s58_s14 = int_to_ptr.vmem [resolvable:$true] %s57_s14 }
   0xe   :  { %63 = dma.hbm_to_vmem [thread:$0]  %s56_s12, 4096, %s58_s14, [#allocation9], %s1204_s30, %s1204_s30, %s1205_s6  }
   0xf   :  { %1192 = dma.done.wait [#allocation3], 128  }
  0x10   :  { %1193 = vsyncadd [#allocation3], 4294967168 }
  0x11   :  { %1194 = dma.done.wait [#allocation6], 2176  }
  0x12   :  { %1195 = vsyncadd [#allocation6], 4294965120 }
  0x13   :  { %1196 = dma.done.wait [#allocation9], 4096  }
  0x14   :  { %1197 = vsyncadd [#allocation9], 4294963200  ;;  %v857_v0 = vld [vmem:[#allocation5 + $0x60] sm:$0xf]  ;;  %v1018_v1 = vld [vmem:[#allocation5 + $0x6c] sm:$0xf0] }
  0x15   :  { %v1016_v2 = vld [vmem:[#allocation5 + $0x64] sm:$0xf]  ;;  %v858_v3 = vor.u32 %v1018_v1, %v857_v0  ;;  %v859_v4 = vld [vmem:[#allocation5 + $0x70] sm:$0xf0]  ;;  %v865_v5 = vld [vmem:[#allocation5 + $0x68] sm:$0xf] }
  0x16   :  { %v1019_v6 = vld [vmem:[#allocation5 + $0x74] sm:$0xf0]  ;;  %v862_v7 = vor.u32 %v1016_v2, %v859_v4  ;;  %v1017_v9 = vld [vmem:[#allocation5 + $0x6c] sm:$0xf]  ;;  %v867_v10 = vld [vmem:[#allocation5 + $0x78] sm:$0xf0] }
  0x17   :  { %v866_v8 = vor.u32 %v1019_v6, %v865_v5  ;;  %v841_v11 = vld [vmem:[#allocation5 + $0x40] sm:$0xf]  ;;  %204 = vmatpush.bf16.msra.mxu0 %v858_v3  ;;  %v870_v12 = vor.u32 %v1017_v9, %v867_v10  ;;  %v1014_v13 = vld [vmem:[#allocation5 + $0x4c] sm:$0xf0]  ;;  %v1012_v14 = vld [vmem:[#allocation5 + $0x44] sm:$0xf] }
  0x18   :  { %v843_v15 = vld [vmem:[#allocation5 + $0x50] sm:$0xf0]  ;;  %218 = vmatpush.bf16.msra.mxu1 %v862_v7  ;;  %v842_v16 = vor.u32 %v1014_v13, %v841_v11  ;;  %v849_v18 = vld [vmem:[#allocation5 + $0x48] sm:$0xf]  ;;  %v1015_v19 = vld [vmem:[#allocation5 + $0x54] sm:$0xf0] }
  0x19   :  { %232 = vmatpush.bf16.msra.mxu2 %v866_v8  ;;  %v846_v17 = vor.u32 %v1012_v14, %v843_v15  ;;  %v1013_v20 = vld [vmem:[#allocation5 + $0x4c] sm:$0xf]  ;;  %246 = vmatpush.bf16.msra.mxu3 %v870_v12  ;;  %v850_v21 = vor.u32 %v1015_v19, %v849_v18  ;;  %v851_v22 = vld [vmem:[#allocation5 + $0x58] sm:$0xf0]  ;;  %v825_v23 = vld [vmem:[#allocation5 + $0x20] sm:$0xf] }
  0x1a   :  { %v1010_v24 = vld [vmem:[#allocation5 + $0x2c] sm:$0xf0]  ;;  %v854_v25 = vor.u32 %v1013_v20, %v851_v22  ;;  %v1008_v26 = vld [vmem:[#allocation5 + $0x24] sm:$0xf]  ;;  %v827_v27 = vld [vmem:[#allocation5 + $0x30] sm:$0xf0] }
  0x1b   :  { %v833_v28 = vld [vmem:[#allocation5 + $0x28] sm:$0xf]  ;;  %205 = vmatpush.bf16.msra.mxu0 %v842_v16  ;;  %v826_v29 = vor.u32 %v1010_v24, %v825_v23  ;;  %v1011_v30 = vld [vmem:[#allocation5 + $0x34] sm:$0xf0]  ;;  %v1009_v31 = vld [vmem:[#allocation5 + $0x2c] sm:$0xf]  ;;  %v830_v33 = vor.u32 %v1008_v26, %v827_v27 }
  0x1c   :  { %v835_v32 = vld [vmem:[#allocation5 + $0x38] sm:$0xf0]  ;;  %219 = vmatpush.bf16.msra.mxu1 %v846_v17  ;;  %v834_v34 = vor.u32 %v1011_v30, %v833_v28  ;;  %v809_v35 = vld [vmem:[#allocation5] sm:$0xf]  ;;  %v1006_v36 = vld [vmem:[#allocation5 + $0xc] sm:$0xf0] }
  0x1d   :  { %233 = vmatpush.bf16.msra.mxu2 %v850_v21  ;;  %v1004_v37 = vld [vmem:[#allocation5 + $0x4] sm:$0xf]  ;;  %247 = vmatpush.bf16.msra.mxu3 %v854_v25  ;;  %v838_v38 = vor.u32 %v1009_v31, %v835_v32  ;;  %v811_v39 = vld [vmem:[#allocation5 + $0x10] sm:$0xf0]  ;;  %v817_v40 = vld [vmem:[#allocation5 + $0x8] sm:$0xf]  ;;  %v810_v44 = vor.u32 %v1006_v36, %v809_v35 }
  0x1e   :  { %v1007_v41 = vld [vmem:[#allocation5 + $0x14] sm:$0xf0]  ;;  %v1005_v42 = vld [vmem:[#allocation5 + $0xc] sm:$0xf]  ;;  %v819_v43 = vld [vmem:[#allocation5 + $0x18] sm:$0xf0]  ;;  %v814_v45 = vor.u32 %v1004_v37, %v811_v39 }
  0x1f   :  { %206 = vmatpush.bf16.msra.mxu0 %v826_v29  ;;  %v818_v46 = vor.u32 %v1007_v41, %v817_v40  ;;  %v822_v47 = vor.u32 %v1005_v42, %v819_v43  ;;  %v1003_v48 = vld [vmem:[#allocation2] sm:$0xff]  ;;  %vm196_vm0 = vcmask 523264   ;;  %v1027_v27 = vld [vmem:[#allocation8 + $0x38] sm:$0xff]  ;;  %vm392_vm11 = vcmask 1040384   ;;  %s1208_s15 = smov [#allocation10]   ;;  %s788_s19 = sshll.u32 %s1365_s5, 4  ;;  %s789_s19 = int_to_ptr.hbm [resolvable:$true] %s788_s19 }
  0x20   :  { %220 = vmatpush.bf16.msra.mxu1 %v830_v33  ;;  %v1035_v28 = vld [vmem:[#allocation8 + $0x78] sm:$0xff]  ;;  %vm394_vm13 = vcmask 1042434   ;;  %vm396_vm15 = vcmask 1041408   ;;  %s786_s16 = sshll.u32 %s1208_s15, 4  ;;  %s1210_s20 = smov 8   ;;  %s787_s16 = int_to_ptr.vmem [resolvable:$true] %s786_s16 }
  0x21   :  { %234 = vmatpush.bf16.msra.mxu2 %v834_v34  ;;  %248 = vmatpush.bf16.msra.mxu3 %v838_v38  ;;  %v1043_v29 = vld [vmem:[#allocation8 + $0xb8] sm:$0xff] }
  0x22   :  { %v1051_v34 = vld [vmem:[#allocation8 + $0xf8] sm:$0xff] }
  0x23   :  { %207 = vmatpush.bf16.msra.mxu0 %v810_v44 }
  0x24   :  { %221 = vmatpush.bf16.msra.mxu1 %v814_v45 }
  0x25   :  { %235 = vmatpush.bf16.msra.mxu2 %v818_v46  ;;  %249 = vmatpush.bf16.msra.mxu3 %v822_v47  ;;  %v1026_v47 = vld [vmem:[#allocation8 + $0x30] sm:$0xff] }
  0x26   :  { %871 = vmatmul.msk.bf16.vlgmr.msra.gmra.mxu0 %vm196_vm0, %v1003_v48 }
  0x27   :  { %872 = vmatmul.msk.bf16.vlgmr.msra.gmra.mxu1 %vm196_vm0, %v1003_v48  ;;  %722 = vmatpush.bf16.msrb.mxu0 %v1027_v27 }
  0x28   :  { %873 = vmatmul.msk.bf16.vlgmr.msra.gmra.mxu2 %vm196_vm0, %v1003_v48  ;;  %874 = vmatmul.msk.bf16.vlgmr.msra.gmra.mxu3 %vm196_vm0, %v1003_v48  ;;  %v1034_v48 = vld [vmem:[#allocation8 + $0x70] sm:$0xff] }
  0x29   :  { %736 = vmatpush.bf16.msrb.mxu1 %v1035_v28  ;;  %750 = vmatpush.bf16.msrb.mxu2 %v1043_v29  ;;  %v1024_v29 = vld [vmem:[#allocation8 + $0x20] sm:$0xff] }
  0x2a   :  { %764 = vmatpush.bf16.msrb.mxu3 %v1051_v34  ;;  %v1048_v34 = vld [vmem:[#allocation8 + $0xe0] sm:$0xff] }
  0x2b   :  { %723 = vmatpush.bf16.msrb.mxu0 %v1026_v47  ;;  %v1022_v47 = vld [vmem:[#allocation8 + $0x10] sm:$0xff] }
  0x2d   :  { %737 = vmatpush.bf16.msrb.mxu1 %v1034_v48  ;;  %v1030_v48 = vld [vmem:[#allocation8 + $0x50] sm:$0xff] }
  0xa3   :  { %v1253_v49 = vpop.f32.mrf.mxu0 }
  0xa4   :  { %v1255_v50 = vpop.f32.mrf.mxu1  ;;  %v288_v51 = vmul.f32 %v1253_v49, %v1253_v49 }
  0xa5   :  { %v289_v58 = vmul.f32 %v1255_v50, %v1255_v50 }
  0xab   :  { %v1259_v52 = vpop.f32.mrf.mxu2  ;;  %v1261_v53 = vpop.f32.mrf.mxu3 }
  0xac   :  { %v1263_v54 = vpop.f32.mrf.mxu0  ;;  %v1269_v57 = vpop.f32.mrf.mxu1  ;;  %v290_v5 = vmul.f32 %v1259_v52, %v1259_v52  ;;  %v291_v6 = vmul.f32 %v1261_v53, %v1261_v53 }
  0xad   :  { %v256_v55 = vadd.f32 %v1263_v54, %v1253_v49  ;;  %v292_v56 = vmul.f32 %v1263_v54, %v1263_v54  ;;  %v263_v59 = vadd.f32 %v1269_v57, %v1255_v50  ;;  %v293_v60 = vmul.f32 %v1269_v57, %v1269_v57 }
  0xaf   :  { %v257_v61 = vrot.slane %v256_v55, 4  ;;  %v296_v62 = vadd.f32 %v292_v56, %v288_v51  ;;  %v264_v63 = vrot.slane %v263_v59, 4  ;;  %v303_v0 = vadd.f32 %v293_v60, %v289_v58  ;;  %v1042_v51 = vld [vmem:[#allocation8 + $0xb0] sm:$0xff] }
  0xb0   :  { %v1050_v60 = vld [vmem:[#allocation8 + $0xf0] sm:$0xff]  ;;  %751 = vmatpush.bf16.msrb.mxu2 %v1042_v51 }
  0xb1   :  { %v258_v1 = vadd.f32 %v257_v61, %v256_v55  ;;  %v297_v2 = vrot.slane %v296_v62, 4  ;;  %v265_v3 = vadd.f32 %v264_v63, %v263_v59  ;;  %v304_v4 = vrot.slane %v303_v0, 4  ;;  %765 = vmatpush.bf16.msrb.mxu3 %v1050_v60  ;;  %v1038_v51 = vld [vmem:[#allocation8 + $0x90] sm:$0xff] }
  0xb3   :  { %v259_v7 = vrot.slane %v258_v1, 2  ;;  %v298_v8 = vadd.f32 %v297_v2, %v296_v62  ;;  %v1281_v9 = vpop.f32.mrf.mxu2  ;;  %v266_v10 = vrot.slane %v265_v3, 2  ;;  %v305_v11 = vadd.f32 %v304_v4, %v303_v0  ;;  %v1287_v14 = vpop.f32.mrf.mxu3 }
  0xb4   :  { %v270_v12 = vadd.f32 %v1281_v9, %v1259_v52  ;;  %v294_v13 = vmul.f32 %v1281_v9, %v1281_v9  ;;  %v277_v17 = vadd.f32 %v1287_v14, %v1261_v53  ;;  %v295_v18 = vmul.f32 %v1287_v14, %v1287_v14 }
  0xb5   :  { %v260_v15 = vadd.f32 %v259_v7, %v258_v1  ;;  %v299_v16 = vrot.slane %v298_v8, 2  ;;  %v267_v19 = vadd.f32 %v266_v10, %v265_v3  ;;  %v306_v20 = vrot.slane %v305_v11, 2  ;;  %v1033_v10 = vld [vmem:[#allocation8 + $0x68] sm:$0xff] }
  0xb6   :  { %v271_v21 = vrot.slane %v270_v12, 4  ;;  %v310_v22 = vadd.f32 %v294_v13, %v290_v5  ;;  %v278_v25 = vrot.slane %v277_v17, 4  ;;  %v317_v26 = vadd.f32 %v295_v18, %v291_v6  ;;  %738 = vmatpush.bf16.msrb.mxu1 %v1033_v10 }
  0xb7   :  { %v261_v23 = vrot.slane %v260_v15, 1  ;;  %v300_v24 = vadd.f32 %v299_v16, %v298_v8  ;;  %v268_v30 = vrot.slane %v267_v19, 1  ;;  %v307_v31 = vadd.f32 %v306_v20, %v305_v11  ;;  %v1025_v8 = vld [vmem:[#allocation8 + $0x28] sm:$0xff] }
  0xb8   :  { %v272_v32 = vadd.f32 %v271_v21, %v270_v12  ;;  %v311_v33 = vrot.slane %v310_v22, 4  ;;  %v279_v37 = vadd.f32 %v278_v25, %v277_v17  ;;  %v318_v38 = vrot.slane %v317_v26, 4  ;;  %v1041_v11 = vld [vmem:[#allocation8 + $0xa8] sm:$0xff]  ;;  %724 = vmatpush.bf16.msrb.mxu0 %v1025_v8 }
  0xb9   :  { %v262_v35 = vadd.f32 %v261_v23, %v260_v15  ;;  %v301_v36 = vrot.slane %v300_v24, 1  ;;  %v269_v39 = vadd.f32 %v268_v30, %v267_v19  ;;  %v308_v40 = vrot.slane %v307_v31, 1  ;;  %v1049_v16 = vld [vmem:[#allocation8 + $0xe8] sm:$0xff]  ;;  %752 = vmatpush.bf16.msrb.mxu2 %v1041_v11  ;;  %v1032_v30 = vld [vmem:[#allocation8 + $0x60] sm:$0xff] }
  0xba   :  { %v273_v41 = vrot.slane %v272_v32, 2  ;;  %v312_v42 = vadd.f32 %v311_v33, %v310_v22  ;;  %v280_v45 = vrot.slane %v279_v37, 2  ;;  %v319_v46 = vadd.f32 %v318_v38, %v317_v26  ;;  %766 = vmatpush.bf16.msrb.mxu3 %v1049_v16  ;;  %739 = vmatpush.bf16.msrb.mxu1 %v1032_v30  ;;  %v1031_v38 = vld [vmem:[#allocation8 + $0x58] sm:$0xff]  ;;  %v1036_v11 = vld [vmem:[#allocation8 + $0x80] sm:$0xff] }
  0xbb   :  { %v1293_v43 = vmul.f32 0.0625, %v262_v35  ;;  %v302_v44 = vadd.f32 %v301_v36, %v300_v24  ;;  %v1295_v55 = vmul.f32 0.0625, %v269_v39  ;;  %v309_v56 = vadd.f32 %v308_v40, %v307_v31  ;;  %v1040_v31 = vld [vmem:[#allocation8 + $0xa0] sm:$0xff]  ;;  %v1039_v39 = vld [vmem:[#allocation8 + $0x98] sm:$0xff] }
  0xbc   :  { %v274_v58 = vadd.f32 %v273_v41, %v272_v32  ;;  %v313_v59 = vrot.slane %v312_v42, 2  ;;  %v281_v63 = vadd.f32 %v280_v45, %v279_v37  ;;  %v320_v0 = vrot.slane %v319_v46, 2  ;;  %725 = vmatpush.bf16.msrb.mxu0 %v1024_v29  ;;  %v1023_v37 = vld [vmem:[#allocation8 + $0x18] sm:$0xff] }
  0xbd   :  { %v324_v61 = vmul.f32 0.0625, %v302_v44  ;;  %v328_v62 = vmul.f32 %v1293_v43, %v1293_v43  ;;  %v325_v1 = vmul.f32 0.0625, %v309_v56  ;;  %v329_v2 = vmul.f32 %v1295_v55, %v1295_v55  ;;  %753 = vmatpush.bf16.msrb.mxu2 %v1040_v31  ;;  %v1047_v41 = vld [vmem:[#allocation8 + $0xd8] sm:$0xff] }
  0xbe   :  { %v275_v3 = vrot.slane %v274_v58, 1  ;;  %v314_v4 = vadd.f32 %v313_v59, %v312_v42  ;;  %v282_v6 = vrot.slane %v281_v63, 1  ;;  %v321_v7 = vadd.f32 %v320_v0, %v319_v46  ;;  %767 = vmatpush.bf16.msrb.mxu3 %v1048_v34  ;;  %740 = vmatpush.bf16.msrb.mxu1 %v1031_v38  ;;  %v1046_v59 = vld [vmem:[#allocation8 + $0xd0] sm:$0xff]  ;;  %v1037_v0 = vld [vmem:[#allocation8 + $0x88] sm:$0xff] }
  0xbf   :  { %v332_v5 = vsub.f32 %v324_v61, %v328_v62  ;;  %v333_v12 = vsub.f32 %v325_v1, %v329_v2  ;;  %v1021_v62 = vld [vmem:[#allocation8 + $0x8] sm:$0xff] }
  0xc0   :  { %v276_v13 = vadd.f32 %v275_v3, %v274_v58  ;;  %v315_v15 = vrot.slane %v314_v4, 1  ;;  %v283_v18 = vadd.f32 %v282_v6, %v281_v63  ;;  %v322_v19 = vrot.slane %v321_v7, 1  ;;  %726 = vmatpush.bf16.msrb.mxu0 %v1023_v37  ;;  %v1029_v63 = vld [vmem:[#allocation8 + $0x48] sm:$0xff]  ;;  %v1028_v6 = vld [vmem:[#allocation8 + $0x40] sm:$0xff] }
  0xc1   :  { %v336_v17 = vmax.f32 %v332_v5, 0.0  ;;  %v337_v20 = vmax.f32 %v333_v12, 0.0  ;;  %754 = vmatpush.bf16.msrb.mxu2 %v1039_v39  ;;  %v1045_v2 = vld [vmem:[#allocation8 + $0xc8] sm:$0xff]  ;;  %v1020_v5 = vld [vmem:[#allocation8] sm:$0xff] }
  0xc2   :  { %v1301_v21 = vmul.f32 0.0625, %v276_v13  ;;  %v316_v22 = vadd.f32 %v315_v15, %v314_v4  ;;  %v1305_v24 = vmul.f32 0.0625, %v283_v18  ;;  %v323_v25 = vadd.f32 %v322_v19, %v321_v7  ;;  %768 = vmatpush.bf16.msrb.mxu3 %v1047_v41  ;;  %741 = vmatpush.bf16.msrb.mxu1 %v1030_v48  ;;  %v1044_v12 = vld [vmem:[#allocation8 + $0xc0] sm:$0xff] }
  0xc3   :  { %v1303_v23 = vadd.f32 1e-05, %v336_v17  ;;  %v1307_v26 = vadd.f32 1e-05, %v337_v20 }
  0xc4   :  { %v326_v27 = vmul.f32 0.0625, %v316_v22  ;;  %v330_v28 = vmul.f32 %v1301_v21, %v1301_v21  ;;  %v327_v32 = vmul.f32 0.0625, %v323_v25  ;;  %v331_v33 = vmul.f32 %v1305_v24, %v1305_v24  ;;  %727 = vmatpush.bf16.msrb.mxu0 %v1022_v47 }
  0xc5   :  { %1064 = vrsqrt.f32 %v1303_v23  ;;  %755 = vmatpush.bf16.msrb.mxu2 %v1038_v51  ;;  %vm361_vm2 = vweird.f32 %v1307_v26  ;;  %vm351_vm12 = vweird.f32 %v1303_v23 }
  0xc6   :  { %1066 = vrsqrt.f32 %v1307_v26  ;;  %v334_v35 = vsub.f32 %v326_v27, %v330_v28  ;;  %v335_v36 = vsub.f32 %v327_v32, %v331_v33  ;;  %769 = vmatpush.bf16.msrb.mxu3 %v1046_v59  ;;  %742 = vmatpush.bf16.msrb.mxu1 %v1029_v63 }
  0xc8   :  { %v338_v40 = vmax.f32 %v334_v35, 0.0  ;;  %v339_v42 = vmax.f32 %v335_v36, 0.0  ;;  %728 = vmatpush.bf16.msrb.mxu0 %v1021_v62  ;;  %v340_v36 = vld [vmem:[#allocation7] ss:$2 sm:$0xf] }
  0xc9   :  { %756 = vmatpush.bf16.msrb.mxu2 %v1037_v0 }
  0xca   :  { %v1315_v44 = vadd.f32 1e-05, %v338_v40  ;;  %v1319_v46 = vadd.f32 1e-05, %v339_v42  ;;  %770 = vmatpush.bf16.msrb.mxu3 %v1045_v2  ;;  %743 = vmatpush.bf16.msrb.mxu1 %v1028_v6 }
  0xcb   :  { %v1317_v45 = vpop.eup %1064 }
  0xcc   :  { %v1067_v56 = vpop.eup %1066  ;;  %v346_v58 = vmul.f32 %v1317_v45, %v1303_v23  ;;  %1068 = vrsqrt.f32 %v1315_v44  ;;  %729 = vmatpush.bf16.msrb.mxu0 %v1020_v5  ;;  %vm371_vm6 = vweird.f32 %v1315_v44  ;;  %vm352_vm7 = vweird.f32 %v1317_v45 }
  0xcd   :  { %v356_v60 = vmul.f32 %v1067_v56, %v1307_v26  ;;  %1070 = vrsqrt.f32 %v1319_v46  ;;  %vm362_vm1 = vweird.f32 %v1067_v56  ;;  %757 = vmatpush.bf16.msrb.mxu2 %v1036_v11  ;;  %vm381_vm9 = vweird.f32 %v1319_v46  ;;  %vm353_vm14 = vmor %vm351_vm12, %vm352_vm7 }
  0xce   :  { %v347_v1 = vmul.f32 %v1317_v45, %v346_v58  ;;  %771 = vmatpush.bf16.msrb.mxu3 %v1044_v12  ;;  %vm363_vm3 = vmor %vm361_vm2, %vm362_vm1 }
  0xcf   :  { %v357_v61 = vmul.f32 %v1067_v56, %v356_v60  ;;  %v401_v60 = vld [vmem:[#allocation7 + $0x1] ss:$2 sm:$0xf] }
  0xd0   :  { %v348_v13 = vmul.f32 0.5, %v347_v1 }
  0xd1   :  { %v358_v3 = vmul.f32 0.5, %v357_v61 }
  0xd2   :  { %v1069_v4 = vpop.eup %1068  ;;  %v349_v20 = vsub.f32 1.5, %v348_v13 }
  0xd3   :  { %v1071_v7 = vpop.eup %1070  ;;  %v359_v8 = vsub.f32 1.5, %v358_v3  ;;  %v366_v10 = vmul.f32 %v1069_v4, %v1315_v44  ;;  %vm372_vm4 = vweird.f32 %v1069_v4 }
  0xd4   :  { %v376_v15 = vmul.f32 %v1071_v7, %v1319_v46  ;;  %vm382_vm5 = vweird.f32 %v1071_v7  ;;  %v350_v30 = vmul.f32 %v1317_v45, %v349_v20  ;;  %vm373_vm8 = vmor %vm371_vm6, %vm372_vm4 }
  0xd5   :  { %v367_v16 = vmul.f32 %v1069_v4, %v366_v10  ;;  %v360_v17 = vmul.f32 %v1067_v56, %v359_v8  ;;  %vm383_vm10 = vmor %vm381_vm9, %vm382_vm5 }
  0xd6   :  { %v377_v18 = vmul.f32 %v1071_v7, %v376_v15  ;;  %v354_v37 = vsel %vm353_vm14, %v1317_v45, %v350_v30 }
  0xd7   :  { %v368_v19 = vmul.f32 0.5, %v367_v16  ;;  %v364_v27 = vsel %vm363_vm3, %v1067_v56, %v360_v17 }
  0xd8   :  { %v378_v22 = vmul.f32 0.5, %v377_v18  ;;  %v389_v32 = vrot.slane %v364_v27, 7 }
  0xd9   :  { %v369_v25 = vsub.f32 1.5, %v368_v19 }
  0xda   :  { %v379_v28 = vsub.f32 1.5, %v378_v22  ;;  %v393_v38 = vsel %vm392_vm11, %v354_v37, %v389_v32  ;;  %v1063_v32 = vld [vmem:[%s1364_s4] ss:$0 sm:$0xff]  ;;  %s1209_s4 = smov 128  }
  0xdb   :  { %v370_v29 = vmul.f32 %v1069_v4, %v369_v25 }
  0xdc   :  { %v380_v31 = vmul.f32 %v1071_v7, %v379_v28 }
  0xdd   :  { %v374_v26 = vsel %vm373_vm8, %v1069_v4, %v370_v29 }
  0xde   :  { %v390_v33 = vrot.slane %v374_v26, 6  ;;  %v384_v34 = vsel %vm383_vm10, %v1071_v7, %v380_v31 }
  0xdf   :  { %v391_v35 = vrot.slane %v384_v34, 5 }
  0xe1   :  { %v395_v39 = vsel %vm394_vm13, %v390_v33, %v391_v35 }
  0xe2   :  { %v397_v40 = vsel %vm396_vm15, %v393_v38, %v395_v39 }
  0xe3   :  { %v399_v41 = vmul.f32 %v397_v40, %v340_v36 }
  0xe5   :  { %v403_v42 = vperm.slane %v399_v41, 0  ;;  %v404_v44 = vperm.slane %v399_v41, 1  ;;  %v405_v46 = vperm.slane %v399_v41, 2  ;;  %v406_v23 = vperm.slane %v399_v41, 3 }
  0xe7   :  { %v412_v47 = vmul.f32 %v404_v44, %v1295_v55  ;;  %v413_v48 = vmul.f32 %v405_v46, %v1301_v21  ;;  %v414_v51 = vmul.f32 %v406_v23, %v1305_v24  ;;  %v411_v56 = vmul.f32 %v403_v42, %v1293_v43 }
  0xe8   :  { %v434_v1 = vmul.f32 %v406_v23, %v1287_v14  ;;  %v427_v55 = vmul.f32 %v403_v42, %v1253_v49  ;;  %v431_v21 = vmul.f32 %v403_v42, %v1263_v54  ;;  %v428_v24 = vmul.f32 %v404_v44, %v1255_v50 }
  0xe9   :  { %v419_v45 = vrot.slane %v412_v47, 7  ;;  %v420_v58 = vrot.slane %v413_v48, 6  ;;  %v421_v59 = vrot.slane %v414_v51, 5  ;;  %v432_v5 = vmul.f32 %v404_v44, %v1269_v57 }
  0xea   :  { %v429_v6 = vmul.f32 %v405_v46, %v1259_v52  ;;  %v433_v7 = vmul.f32 %v405_v46, %v1281_v9  ;;  %v430_v8 = vmul.f32 %v406_v23, %v1261_v53 }
  0xeb   :  { %v422_v61 = vsel %vm392_vm11, %v411_v56, %v419_v45  ;;  %v423_v62 = vsel %vm394_vm13, %v420_v58, %v421_v59 }
  0xec   :  { %v424_v63 = vsel %vm396_vm15, %v422_v61, %v423_v62 }
  0xed   :  { %v426_v0 = vsub.f32 %v401_v60, %v424_v63 }
  0xef   :  { %v439_v43 = vperm.slane %v426_v0, 3  ;;  %v436_v2 = vperm.slane %v426_v0, 0  ;;  %v437_v3 = vperm.slane %v426_v0, 1  ;;  %v438_v4 = vperm.slane %v426_v0, 2 }
  0xf1   :  { %v451_v10 = vadd.f32 %v439_v43, %v434_v1  ;;  %v444_v14 = vadd.f32 %v436_v2, %v427_v55  ;;  %v448_v11 = vadd.f32 %v436_v2, %v431_v21  ;;  %v445_v49 = vadd.f32 %v437_v3, %v428_v24 }
  0xf2   :  { %v449_v12 = vadd.f32 %v437_v3, %v432_v5  ;;  %v446_v54 = vadd.f32 %v438_v4, %v429_v6  ;;  %v450_v13 = vadd.f32 %v438_v4, %v433_v7  ;;  %v447_v50 = vadd.f32 %v439_v43, %v430_v8 }
  0xf3   :  { %v452_v15 = vmax.f32 %v444_v14, 0.0  ;;  %v456_v16 = vmax.f32 %v448_v11, 0.0  ;;  %v453_v17 = vmax.f32 %v445_v49, 0.0  ;;  %v459_v18 = vmax.f32 %v451_v10, 0.0 }
  0xf4   :  { %v457_v19 = vmax.f32 %v449_v12, 0.0  ;;  %v454_v57 = vmax.f32 %v446_v54, 0.0  ;;  %v458_v20 = vmax.f32 %v450_v13, 0.0  ;;  %v455_v52 = vmax.f32 %v447_v50, 0.0 }
  0xf5   :  { %v462_v22 = vpack.c.bf16 %v456_v16, %v452_v15 }
  0xf6   :  { %v463_v9 = vpack.c.bf16 %v457_v19, %v453_v17  ;;  %v464_v25 = vpack.c.bf16 %v458_v20, %v454_v57  ;;  %v465_v53 = vpack.c.bf16 %v459_v18, %v455_v52 }
  0xf7   :  { %730 = vmatmul.bf16.vlgmr.msrb.gmra.mxu0 %v462_v22 }
  0xf8   :  { %744 = vmatmul.bf16.vlgmr.msrb.gmra.mxu1 %v463_v9  ;;  %758 = vmatmul.bf16.vlgmr.msrb.gmra.mxu2 %v464_v25 }
  0xf9   :  { %772 = vmatmul.bf16.vlgmr.msrb.gmra.mxu3 %v465_v53 }
 0x174   :  { %v731_v27 = vpop.f32.mrf.mxu0 }
 0x175   :  { %v745_v28 = vpop.f32.mrf.mxu1 }
 0x176   :  { %v746_v29 = vadd.f32 %v745_v28, %v731_v27 }
 0x17b   :  { %v759_v30 = vpop.f32.mrf.mxu2 }
 0x17c   :  { %v760_v31 = vadd.f32 %v759_v30, %v746_v29  ;;  %v773_v26 = vpop.f32.mrf.mxu3  ;;  %v733_v34 = vpop.f32.mrf.mxu0 }
 0x17d   :  { %v747_v35 = vpop.f32.mrf.mxu1 }
 0x17e   :  { %v774_v33 = vadd.f32 %v773_v26, %v760_v31  ;;  %v748_v37 = vadd.f32 %v747_v35, %v733_v34 }
 0x180   :  { %v778_v36 = vadd.f32 %v1063_v32, %v774_v33 }
 0x182   :  { %780 = vst [vmem:[#allocation10] sm:$0xff] %v778_v36 }
 0x183   :  { %v761_v38 = vpop.f32.mrf.mxu2 }
 0x184   :  { %v762_v39 = vadd.f32 %v761_v38, %v748_v37  ;;  %v775_v40 = vpop.f32.mrf.mxu3 }
 0x186   :  { %v776_v41 = vadd.f32 %v775_v40, %v762_v39 }
 0x188   :  { %v779_v42 = vadd.f32 %v1063_v32, %v776_v41 }
 0x18a   :  { %781 = vst [vmem:[#allocation10 + $0x8] sm:$0xff] %v779_v42 }
 0x18b   :  { %794 = dma.vmem_to_hbm [thread:$0]  %s787_s16, 256, %s789_s19, [#allocation4], %s1209_s4, %s1209_s4, %s1210_s20  }
 0x18c   :  { %1198 = dma.done.wait [#allocation4], 256  }
 0x18d   :  { %1199 = vsyncadd [#allocation4], 4294967040 }
 0x18e   :  { %799 = vsyncpa [#allocation3], 1 }
 0x18f   :  { %800 = vsyncpa [#allocation6], 1 }
 0x190   :  { %801 = vsyncpa [#allocation9], 1 }
 0x191   :  { %802 = vsyncpa [#allocation4], 1 }

</bundles_post_ra>
